<compile_context>
chip_gen: v5e
topology: v5e:2x2
jax: 0.10.0
libtpu: 0.0.40
codegen_flags: <defaults>
</compile_context>

<pallas_src>
import functools

import jax
import jax.numpy as jnp
from jax.experimental import pallas as pl
from jax.experimental.pallas import tpu as pltpu

LANE = 128
SUBLANE = 8


def _round_up(n, m):
    return ((n + m - 1) // m) * m


def _mlp_kernel(x_ref, w1_ref, w23_ref, b_ref, o_ref):
    x = x_ref[...]          # (block_m, K)   f32, true K lanes
    b = b_ref[...]          # (3, P)         f32, stacked [b1; b2; b3]

    # ----- l1: x @ W1 + b1, ReLU -----
    h1 = jnp.dot(x, w1_ref[...], preferred_element_type=jnp.float32) + b[0:1, :]
    h1 = jnp.maximum(h1, 0.0)

    # ----- l2: h1 @ W2 + b2, LeakyReLU(0.01) == max(z, 0.01*z) -----
    h2 = jnp.dot(h1, w23_ref[0], preferred_element_type=jnp.float32) + b[1:2, :]
    h2 = jnp.maximum(h2, 0.01 * h2)

    # ----- l3: h2 @ W3 + b3 ; store only the true output columns (narrow vst) -----
    y = jnp.dot(h2, w23_ref[1], preferred_element_type=jnp.float32) + b[2:3, :]
    o_ref[...] = y[:, : o_ref.shape[-1]].astype(o_ref.dtype)


def pad_params(w1, b1, w2, b2, w3, b3):
    """Pack + zero-pad parameters once (reused across calls).

    Returns ((w1_p, w23_p, b_p), (K, H1, H2, OUT)) where
      w1_p : (K, P)        — W1 with its output dim padded to P (multiple of 128)
      w23_p: (2, P, P)     — stacked, zero-padded W2 and W3
      b_p  : (3, P)        — stacked, zero-padded b1, b2, b3
    Zero padding is mathematically inert: ReLU(0)=LeakyReLU(0)=0 and the padded
    rows/cols of the weights are zero; the extra output columns are never stored.
    """
    k, h1 = w1.shape
    h2 = w2.shape[1]
    out = w3.shape[1]
    p = max(_round_up(h1, LANE), _round_up(h2, LANE), _round_up(out, LANE))

    def pad2(a, rows, cols):
        a = jnp.asarray(a, jnp.float32)
        return jnp.zeros((rows, cols), jnp.float32).at[: a.shape[0], : a.shape[1]].set(a)

    w1_p = pad2(w1, k, p)
    w23_p = jnp.stack([pad2(w2, p, p), pad2(w3, p, p)], axis=0)            # (2, P, P)
    b_p = jnp.concatenate([pad2(b1, 1, p), pad2(b2, 1, p), pad2(b3, 1, p)], axis=0)  # (3, P)
    return (w1_p, w23_p, b_p), (k, h1, h2, out)


@functools.partial(jax.jit, static_argnames=("dims",))
def my_architecture_forward(x, w1, w23, b, dims):
    """x: (batch, NumInputNodes) unpadded.  (w1, w23, b) from pad_params; dims static."""
    k, h1_t, h2_t, out_dim = dims
    batch = x.shape[0]
    assert x.shape[1] == k == w1.shape[0]
    p = w1.shape[1]

    # Pad batch only to a sublane multiple (8).  No lane padding of x.
    batch_p = _round_up(max(batch, SUBLANE), SUBLANE)
    x_f = x.astype(jnp.float32)
    if batch_p != batch:
        x_f = jnp.zeros((batch_p, k), jnp.float32).at[:batch].set(x_f)

    # Batch tiling: up to 1024 rows per grid step; >=2 steps whenever possible so
    # the "parallel" axis can shard across TensorCores (v7x).  cdiv grid => no
    # wasted full-tile rounding of the batch.
    block_m = min(1024, _round_up(pl.cdiv(batch_p, 2), SUBLANE))
    grid_m = pl.cdiv(batch_p, block_m)

    # Advisory cost estimate with the TRUE (unpadded) dims.
    flops = 2 * batch * (k * h1_t + h1_t * h2_t + h2_t * out_dim)
    bytes_accessed = 4 * (
        batch * k
        + k * h1_t + h1_t
        + h1_t * h2_t + h2_t
        + h2_t * out_dim + out_dim
        + batch * out_dim
    )

    y = pl.pallas_call(
        _mlp_kernel,
        out_shape=jax.ShapeDtypeStruct((batch_p, out_dim), jnp.float32),
        grid=(grid_m,),
        in_specs=[
            pl.BlockSpec((block_m, k), lambda i: (i, 0)),   # x, true-K lanes
            pl.BlockSpec((k, p), lambda i: (0, 0)),         # W1
            pl.BlockSpec((2, p, p), lambda i: (0, 0, 0)),   # stacked [W2, W3]
            pl.BlockSpec((3, p), lambda i: (0, 0)),         # stacked [b1, b2, b3]
        ],
        out_specs=pl.BlockSpec((block_m, out_dim), lambda i: (i, 0)),
        compiler_params=pltpu.CompilerParams(
            dimension_semantics=("parallel",),
        ),
        cost_estimate=pl.CostEstimate(
            flops=flops, transcendentals=0, bytes_accessed=bytes_accessed
        ),
    )(x_f, w1, w23, b)

    return y if batch_p == batch else y[:batch]


def init_params(key, num_input_nodes, h1, h2, out_dim=2):
    """Deterministic init mimicking PyTorch nn.Linear default (uniform +-1/sqrt(fan_in)).
    Weights are stored as (in_features, out_features)."""
    ks = jax.random.split(key, 6)

    def linear(kw, kb, fan_in, fan_out):
        bound = 1.0 / jnp.sqrt(float(fan_in))
        w = jax.random.uniform(kw, (fan_in, fan_out), jnp.float32, -bound, bound)
        b = jax.random.uniform(kb, (1, fan_out), jnp.float32, -bound, bound)
        return w, b

    w1, b1 = linear(ks[0], ks[1], num_input_nodes, h1)
    w2, b2 = linear(ks[2], ks[3], h1, h2)
    w3, b3 = linear(ks[4], ks[5], h2, out_dim)
    return w1, b1, w2, b2, w3, b3


def reference_forward(x, w1, b1, w2, b2, w3, b3):
    h1 = jnp.maximum(x @ w1 + b1, 0.0)
    z2 = h1 @ w2 + b2
    h2 = jnp.where(z2 >= 0.0, z2, 0.01 * z2)
    return h2 @ w3 + b3


if __name__ == "__main__":
    # Shapes consistent with the module: batch=8, NumInputNodes=32,
    # NumNodesHidden1=100, NumNodesHidden2=100, output=2 (Q-values for 2 actions).
    NumInputNodes = 32
    NumNodesHidden1 = 100
    NumNodesHidden2 = 100
    batch = 8

    key = jax.random.PRNGKey(0)
    kx, kp = jax.random.split(key)
    x = jax.random.normal(kx, (batch, NumInputNodes), jnp.float32)

    raw_params = init_params(kp, NumInputNodes, NumNodesHidden1, NumNodesHidden2)
    packed_params, dims = pad_params(*raw_params)   # pack/pad once, reuse across calls

    y = my_architecture_forward(x, *packed_params, dims=dims)
    y = jax.block_until_ready(y)

    y_ref = reference_forward(x, *raw_params)
    assert y.shape == (batch, 2)
    assert jnp.allclose(y, y_ref, atol=1e-4, rtol=1e-4)

    print("KERNEL_OK")
</pallas_src>

<mosaic_0001>
module attributes {stable_mosaic.version = 11 : i64} {
  func.func @_mlp_kernel(%arg0: i32, %arg1: memref<8x32xf32, #tpu.memory_space<vmem>>, %arg2: memref<32x128xf32, #tpu.memory_space<vmem>>, %arg3: memref<2x128x128xf32, #tpu.memory_space<vmem>>, %arg4: memref<3x128xf32, #tpu.memory_space<vmem>>, %arg5: memref<8x2xf32, #tpu.memory_space<vmem>>) attributes {dimension_semantics = [#tpu.dimension_semantics<parallel>], iteration_bounds = array<i64: 1>, scalar_prefetch = 0 : i64, scratch_operands = 0 : i64, tpu.core_type = #tpu.core_type<tc>, window_params = [{transform_indices = @transform_0, window_bounds = array<i64: 8, 32>}, {pipeline_mode = #tpu.pipeline_mode<synchronous>, transform_indices = @transform_1, window_bounds = array<i64: 32, 128>}, {pipeline_mode = #tpu.pipeline_mode<synchronous>, transform_indices = @transform_2, window_bounds = array<i64: 2, 128, 128>}, {pipeline_mode = #tpu.pipeline_mode<synchronous>, transform_indices = @transform_3, window_bounds = array<i64: 3, 128>}, {transform_indices = @transform_4, window_bounds = array<i64: 8, 2>}]} {
    %c0 = arith.constant 0 : index
    %c0_0 = arith.constant 0 : index
    %0 = vector.load %arg1[%c0, %c0_0] : memref<8x32xf32, #tpu.memory_space<vmem>>, vector<8x32xf32>
    %c0_1 = arith.constant 0 : index
    %c0_2 = arith.constant 0 : index
    %1 = vector.load %arg4[%c0_1, %c0_2] : memref<3x128xf32, #tpu.memory_space<vmem>>, vector<3x128xf32>
    %c0_3 = arith.constant 0 : index
    %c0_4 = arith.constant 0 : index
    %2 = vector.load %arg2[%c0_3, %c0_4] : memref<32x128xf32, #tpu.memory_space<vmem>>, vector<32x128xf32>
    %cst = arith.constant dense<0.000000e+00> : vector<8x128xf32>
    %3 = tpu.matmul %0, %2, %cst {dimension_numbers = #tpu.dot_dimension_numbers<[1], [0], [0], [1], [0, 0, 1, 1], [], []>} : vector<8x32xf32>, vector<32x128xf32>, vector<8x128xf32> -> vector<8x128xf32>
    %4 = vector.extract_strided_slice %1 {offsets = [0, 0], sizes = [1, 128], strides = [1, 1]} : vector<3x128xf32> to vector<1x128xf32>
    %5 = vector.broadcast %4 : vector<1x128xf32> to vector<8x128xf32>
    %6 = arith.addf %3, %5 : vector<8x128xf32>
    %cst_5 = arith.constant 0.000000e+00 : f32
    %7 = vector.broadcast %cst_5 : f32 to vector<8x128xf32>
    %8 = arith.maximumf %6, %7 : vector<8x128xf32>
    %c0_6 = arith.constant 0 : index
    %c0_7 = arith.constant 0 : index
    %c0_8 = arith.constant 0 : index
    %9 = vector.load %arg3[%c0_6, %c0_7, %c0_8] : memref<2x128x128xf32, #tpu.memory_space<vmem>>, vector<1x128x128xf32>
    %10 = vector.shape_cast %9 : vector<1x128x128xf32> to vector<128x128xf32>
    %cst_9 = arith.constant dense<0.000000e+00> : vector<8x128xf32>
    %11 = tpu.matmul %8, %10, %cst_9 {dimension_numbers = #tpu.dot_dimension_numbers<[1], [0], [0], [1], [0, 0, 1, 1], [], []>} : vector<8x128xf32>, vector<128x128xf32>, vector<8x128xf32> -> vector<8x128xf32>
    %12 = vector.extract_strided_slice %1 {offsets = [1, 0], sizes = [1, 128], strides = [1, 1]} : vector<3x128xf32> to vector<1x128xf32>
    %13 = vector.broadcast %12 : vector<1x128xf32> to vector<8x128xf32>
    %14 = arith.addf %11, %13 : vector<8x128xf32>
    %cst_10 = arith.constant 0.00999999977 : f32
    %15 = vector.broadcast %cst_10 : f32 to vector<8x128xf32>
    %16 = arith.mulf %15, %14 : vector<8x128xf32>
    %17 = arith.maximumf %14, %16 : vector<8x128xf32>
    %c1 = arith.constant 1 : index
    %c0_11 = arith.constant 0 : index
    %c0_12 = arith.constant 0 : index
    %18 = vector.load %arg3[%c1, %c0_11, %c0_12] : memref<2x128x128xf32, #tpu.memory_space<vmem>>, vector<1x128x128xf32>
    %19 = vector.shape_cast %18 : vector<1x128x128xf32> to vector<128x128xf32>
    %cst_13 = arith.constant dense<0.000000e+00> : vector<8x128xf32>
    %20 = tpu.matmul %17, %19, %cst_13 {dimension_numbers = #tpu.dot_dimension_numbers<[1], [0], [0], [1], [0, 0, 1, 1], [], []>} : vector<8x128xf32>, vector<128x128xf32>, vector<8x128xf32> -> vector<8x128xf32>
    %21 = vector.extract_strided_slice %1 {offsets = [2, 0], sizes = [1, 128], strides = [1, 1]} : vector<3x128xf32> to vector<1x128xf32>
    %22 = vector.broadcast %21 : vector<1x128xf32> to vector<8x128xf32>
    %23 = arith.addf %20, %22 : vector<8x128xf32>
    %24 = vector.extract_strided_slice %23 {offsets = [0, 0], sizes = [8, 2], strides = [1, 1]} : vector<8x128xf32> to vector<8x2xf32>
    %c0_14 = arith.constant 0 : index
    %c0_15 = arith.constant 0 : index
    %25 = vector.load %arg5[%c0_14, %c0_15] : memref<8x2xf32, #tpu.memory_space<vmem>>, vector<8x2xf32>
    tpu.vector_store %arg5[%c0_14, %c0_15], %24 {strides = array<i32>} : memref<8x2xf32, #tpu.memory_space<vmem>>, vector<8x2xf32>,
    return
  }
  func.func @transform_0(%arg0: i32) -> (i32, i32) {
    %c0_i32 = arith.constant 0 : i32
    %c0_i32_0 = arith.constant 0 : i32
    return %arg0, %c0_i32 : i32, i32
  }
  func.func @transform_1(%arg0: i32) -> (i32, i32) {
    %c0_i32 = arith.constant 0 : i32
    %c0_i32_0 = arith.constant 0 : i32
    %c0_i32_1 = arith.constant 0 : i32
    return %c0_i32, %c0_i32_0 : i32, i32
  }
  func.func @transform_2(%arg0: i32) -> (i32, i32, i32) {
    %c0_i32 = arith.constant 0 : i32
    %c0_i32_0 = arith.constant 0 : i32
    %c0_i32_1 = arith.constant 0 : i32
    %c0_i32_2 = arith.constant 0 : i32
    return %c0_i32, %c0_i32_0, %c0_i32_1 : i32, i32, i32
  }
  func.func @transform_3(%arg0: i32) -> (i32, i32) {
    %c0_i32 = arith.constant 0 : i32
    %c0_i32_0 = arith.constant 0 : i32
    %c0_i32_1 = arith.constant 0 : i32
    return %c0_i32, %c0_i32_0 : i32, i32
  }
  func.func @transform_4(%arg0: i32) -> (i32, i32) {
    %c0_i32 = arith.constant 0 : i32
    %c0_i32_0 = arith.constant 0 : i32
    return %arg0, %c0_i32 : i32, i32
  }
}

</mosaic_0001>

<bundles_post_ra>
// kernel: my_architecture_forward.1
= control target key start
LH: loop header
LB: loop body
LE: loop exit
PB: predicated region body
PF: predicated region fallthrough
CT: control target
= control target key end

     0   :  { %9 = vsyncpa [#allocation3], 0  ;;  %s349_s0 = inlined_call_operand.hbm [shape: f32[8,32], index: 0, kind: input, shape index: {}]   ;;  %s350_s1 = inlined_call_operand.hbm [shape: f32[32,128], index: 1, kind: input, shape index: {}]   ;;  %s351_s2 = inlined_call_operand.hbm [shape: f32[2,128,128], index: 2, kind: input, shape index: {}]   ;;  %s352_s3 = inlined_call_operand.hbm [shape: f32[3,128], index: 3, kind: input, shape index: {}]   ;;  %s353_s4 = inlined_call_operand.vmem [shape: f32[8,2], index: 4, kind: output, shape index: {}]  }
   0x1   :  { %10 = vsyncpa [#allocation5], 0  ;;  %s27_s17 = sshll.u32 %s350_s1, 4  ;;  %s28_s17 = int_to_ptr.hbm [resolvable:$true] %s27_s17 }
   0x2   :  { %11 = vsyncpa [#allocation8], 0  ;;  %s303_s18 = smov [#allocation4]   ;;  %s17_s22 = sshll.u32 %s349_s0, 4  ;;  %s18_s22 = int_to_ptr.hbm [resolvable:$true] %s17_s22 }
   0x3   :  { %s29_s19 = sshll.u32 %s303_s18, 4  ;;  %s304_s23 = smov 128   ;;  %s30_s19 = int_to_ptr.vmem [resolvable:$true] %s29_s19 }
   0x4   :  { %s305_s24 = smov 8   ;;  %s306_s25 = smov [#allocation2]  }
   0x5   :  { %35 = dma.hbm_to_vmem [thread:$0]  %s28_s17, 512, %s30_s19, [#allocation5], %s304_s23, %s304_s23, %s305_s24  }
   0x6   :  { %s19_s26 = sshll.u32 %s306_s25, 4  ;;  %s40_s29 = sshll.u32 %s351_s2, 4  ;;  %s20_s26 = int_to_ptr.vmem [resolvable:$true] %s19_s26  ;;  %s41_s29 = int_to_ptr.hbm [resolvable:$true] %s40_s29 }
   0x7   :  { %22 = dma.hbm_to_vmem [thread:$0]  %s18_s22, 128, %s20_s26, [#allocation3]  }
   0x8   :  { %s54_s5 = sshll.u32 %s352_s3, 4  ;;  %s307_s6 = smov [#allocation6]   ;;  %s55_s5 = int_to_ptr.hbm [resolvable:$true] %s54_s5 }
   0x9   :  { %s42_s7 = sshll.u32 %s307_s6, 4  ;;  %s308_s0 = smov [#allocation7]   ;;  %s43_s7 = int_to_ptr.vmem [resolvable:$true] %s42_s7 }
   0xa   :  { %48 = dma.hbm_to_vmem [thread:$0]  %s41_s29, 4096, %s43_s7, [#allocation5], %s304_s23, %s304_s23, %s305_s24  }
   0xb   :  { %s56_s8 = sshll.u32 %s308_s0, 4  ;;  %s57_s8 = int_to_ptr.vmem [resolvable:$true] %s56_s8 }
   0xc   :  { %59 = dma.hbm_to_vmem [thread:$0]  %s55_s5, 64, %s57_s8, [#allocation8]  }
   0xd   :  { %297 = dma.done.wait [#allocation3], 128  }
   0xe   :  { %298 = vsyncadd [#allocation3], 4294967168 }
   0xf   :  { %299 = dma.done.wait [#allocation5], 4608  }
  0x10   :  { %300 = vsyncadd [#allocation5], 4294962688 }
  0x11   :  { %301 = dma.done.wait [#allocation8], 64  }
  0x12   :  { %302 = vsyncadd [#allocation8], 4294967232  ;;  %v81_v0 = vld [vmem:[#allocation4 + $0x18] sm:$0xff]  ;;  %v80_v1 = vld [vmem:[#allocation4 + $0x10] sm:$0xff]  ;;  %vm83_vm0 = vcmask 261120   ;;  %vm185_vm1 = vcmask 15360  }
  0x13   :  { %99 = vmatpush.msra.mxu0 %v81_v0  ;;  %v123_v2 = vld [vmem:[#allocation6 + $0x78] sm:$0xff]  ;;  %v79_v3 = vld [vmem:[#allocation4 + $0x8] sm:$0xff]  ;;  %v122_v4 = vld [vmem:[#allocation6 + $0x70] sm:$0xff] }
  0x14   :  { %125 = vmatpush.msra.mxu1 %v123_v2  ;;  %v121_v5 = vld [vmem:[#allocation6 + $0x68] sm:$0xff]  ;;  %v78_v6 = vld [vmem:[#allocation4] sm:$0xff]  ;;  %v76_v7 = vld [vmem:[#allocation2] sm:$0xff] }
  0x15   :  { %100 = vmatpush.msra.mxu0 %v80_v1  ;;  %v120_v8 = vld [vmem:[#allocation6 + $0x60] sm:$0xff]  ;;  %v119_v9 = vld [vmem:[#allocation6 + $0x58] sm:$0xff]  ;;  %v118_v10 = vld [vmem:[#allocation6 + $0x50] sm:$0xff] }
  0x16   :  { %126 = vmatpush.msra.mxu1 %v122_v4  ;;  %v117_v11 = vld [vmem:[#allocation6 + $0x48] sm:$0xff]  ;;  %v116_v12 = vld [vmem:[#allocation6 + $0x40] sm:$0xff]  ;;  %v115_v13 = vld [vmem:[#allocation6 + $0x38] sm:$0xff] }
  0x17   :  { %101 = vmatpush.msra.mxu0 %v79_v3  ;;  %v114_v14 = vld [vmem:[#allocation6 + $0x30] sm:$0xff]  ;;  %v113_v15 = vld [vmem:[#allocation6 + $0x28] sm:$0xff]  ;;  %v112_v16 = vld [vmem:[#allocation6 + $0x20] sm:$0xff] }
  0x18   :  { %127 = vmatpush.msra.mxu1 %v121_v5  ;;  %v111_v17 = vld [vmem:[#allocation6 + $0x18] sm:$0xff]  ;;  %v110_v18 = vld [vmem:[#allocation6 + $0x10] sm:$0xff]  ;;  %v109_v19 = vld [vmem:[#allocation6 + $0x8] sm:$0xff] }
  0x19   :  { %102 = vmatpush.msra.mxu0 %v78_v6  ;;  %v108_v20 = vld [vmem:[#allocation6] sm:$0xff]  ;;  %v163_v21 = vld [vmem:[#allocation6 + $0xf8] sm:$0xff]  ;;  %v162_v22 = vld [vmem:[#allocation6 + $0xf0] sm:$0xff] }
  0x1a   :  { %194 = vmatmul.msk.f32.vlgmr.msra.gmra.mxu0 %vm83_vm0, %v76_v7  ;;  %128 = vmatpush.msra.mxu1 %v120_v8  ;;  %v161_v23 = vld [vmem:[#allocation6 + $0xe8] sm:$0xff]  ;;  %v160_v24 = vld [vmem:[#allocation6 + $0xe0] sm:$0xff]  ;;  %v159_v25 = vld [vmem:[#allocation6 + $0xd8] sm:$0xff] }
  0x1b   :  { %165 = vmatpush.msra.mxu2 %v163_v21  ;;  %v158_v26 = vld [vmem:[#allocation6 + $0xd0] sm:$0xff]  ;;  %v157_v27 = vld [vmem:[#allocation6 + $0xc8] sm:$0xff]  ;;  %v156_v28 = vld [vmem:[#allocation6 + $0xc0] sm:$0xff] }
  0x1c   :  { %129 = vmatpush.msra.mxu1 %v119_v9  ;;  %v155_v29 = vld [vmem:[#allocation6 + $0xb8] sm:$0xff]  ;;  %v154_v30 = vld [vmem:[#allocation6 + $0xb0] sm:$0xff]  ;;  %v153_v31 = vld [vmem:[#allocation6 + $0xa8] sm:$0xff] }
  0x1d   :  { %166 = vmatpush.msra.mxu2 %v162_v22  ;;  %v152_v32 = vld [vmem:[#allocation6 + $0xa0] sm:$0xff]  ;;  %v151_v38 = vld [vmem:[#allocation6 + $0x98] sm:$0xff]  ;;  %v150_v39 = vld [vmem:[#allocation6 + $0x90] sm:$0xff] }
  0x1e   :  { %130 = vmatpush.msra.mxu1 %v118_v10  ;;  %v77_v33 = vld [vmem:[#allocation7] sm:$0x7]  ;;  %v149_v40 = vld [vmem:[#allocation6 + $0x88] sm:$0xff] }
  0x1f   :  { %167 = vmatpush.msra.mxu2 %v161_v23  ;;  %v82_v34 = vperm.slane %v77_v33, 0  ;;  %v148_v41 = vld [vmem:[#allocation6 + $0x80] sm:$0xff]  ;;  %v124_v42 = vperm.slane %v77_v33, 1  ;;  %v164_v47 = vperm.slane %v77_v33, 2 }
  0x20   :  { %131 = vmatpush.msra.mxu1 %v117_v11 }
  0x21   :  { %168 = vmatpush.msra.mxu2 %v160_v24 }
  0x22   :  { %132 = vmatpush.msra.mxu1 %v116_v12 }
  0x23   :  { %169 = vmatpush.msra.mxu2 %v159_v25 }
  0x24   :  { %133 = vmatpush.msra.mxu1 %v115_v13 }
  0x25   :  { %170 = vmatpush.msra.mxu2 %v158_v26 }
  0x26   :  { %134 = vmatpush.msra.mxu1 %v114_v14 }
  0x27   :  { %171 = vmatpush.msra.mxu2 %v157_v27 }
  0x28   :  { %135 = vmatpush.msra.mxu1 %v113_v15 }
  0x29   :  { %172 = vmatpush.msra.mxu2 %v156_v28 }
  0x2a   :  { %136 = vmatpush.msra.mxu1 %v112_v16 }
  0x2b   :  { %173 = vmatpush.msra.mxu2 %v155_v29 }
  0x2c   :  { %137 = vmatpush.msra.mxu1 %v111_v17 }
  0x2d   :  { %174 = vmatpush.msra.mxu2 %v154_v30 }
  0x2e   :  { %138 = vmatpush.msra.mxu1 %v110_v18 }
  0x2f   :  { %175 = vmatpush.msra.mxu2 %v153_v31 }
  0x30   :  { %139 = vmatpush.msra.mxu1 %v109_v19 }
  0x31   :  { %176 = vmatpush.msra.mxu2 %v152_v32 }
  0x32   :  { %140 = vmatpush.msra.mxu1 %v108_v20 }
  0x33   :  { %177 = vmatpush.msra.mxu2 %v151_v38 }
  0x35   :  { %178 = vmatpush.msra.mxu2 %v150_v39 }
  0x37   :  { %179 = vmatpush.msra.mxu2 %v149_v40 }
  0x39   :  { %180 = vmatpush.msra.mxu2 %v148_v41 }
  0x97   :  { %v104_v35 = vpop.f32.mrf.mxu0 }
  0x98   :  { %v105_v36 = vadd.f32 %v104_v35, %v82_v34 }
  0x9a   :  { %v107_v37 = vmax.f32 %v105_v36, 0.0 }
  0x9c   :  { %141 = vmatmul.f32.vlgmr.msra.gmra.mxu1 %v107_v37 }
 0x119   :  { %v142_v43 = vpop.f32.mrf.mxu1 }
 0x11a   :  { %v143_v44 = vadd.f32 %v142_v43, %v124_v42 }
 0x11c   :  { %v145_v45 = vmul.f32 0.01, %v143_v44 }
 0x11e   :  { %v146_v46 = vmax.f32 %v143_v44, %v145_v45 }
 0x120   :  { %181 = vmatmul.f32.vlgmr.msra.gmra.mxu2 %v146_v46 }
 0x1a3   :  { %v182_v48 = vpop.f32.mrf.mxu2 }
 0x1a4   :  { %v183_v49 = vadd.f32 %v182_v48, %v164_v47 }
 0x1a6   :  { %186 = vst.msk [vmem:[%s353_s4] sm:$0xff] %vm185_vm1, %v183_v49 }
 0x1a7   :  { %191 = vsyncpa [#allocation3], 1 }
 0x1a8   :  { %192 = vsyncpa [#allocation5], 1 }
 0x1a9   :  { %193 = vsyncpa [#allocation8], 1 }

</bundles_post_ra>
